<compile_context>
chip_gen: v7x
topology: tpu7x:2x2x1
jax: 0.10.0
libtpu: 0.0.40
codegen_flags: <defaults>
</compile_context>

<pallas_src>
import jax
import jax.numpy as jnp
from jax.experimental import pallas as pl
from jax.experimental.pallas import tpu as pltpu

H1 = 512          # hidden 1
H2 = 64           # hidden 2 (logical)
H2_PAD = 128      # hidden 2 padded to lane width
OUT = 10          # logical output
OUT_PAD = 128     # output padded to lane width
IN = 28 * 28      # 784


def _round_up(n, m):
    return (n + m - 1) // m * m


def mlp_kernel(x_ref, w1_ref, b1_ref, w2_ref, b2_ref, w3_ref, b3_ref, o_ref):
    """One batch tile: three MXU matmuls (bf16 in, f32 acc) + f32 activations."""
    x = x_ref[...]                                                     # (TB, 784) bf16
    h1 = jnp.tanh(
        jnp.dot(x, w1_ref[...], preferred_element_type=jnp.float32) + b1_ref[...]
    ).astype(jnp.bfloat16)                                             # (TB, 512)
    h2 = jnp.tanh(
        jnp.dot(h1, w2_ref[...], preferred_element_type=jnp.float32) + b2_ref[...]
    ).astype(jnp.bfloat16)                                             # (TB, 128) (cols >=64 are 0)
    logits = (
        jnp.dot(h2, w3_ref[...], preferred_element_type=jnp.float32) + b3_ref[...]
    )                                                                  # (TB, 128)
    o_ref[...] = jax.nn.sigmoid(logits)                                # lane-dense store


def neural_network_forward(x, params):
    """x: (B, 784) f32.  params: f32 (in, out) weights + (1, out) biases.
    Returns (B, 10) f32 sigmoid outputs."""
    w1, b1, w2, b2, w3, b3 = params
    B = x.shape[0]

    # Batch tile: up to 1024 rows, multiple of 8 sublanes.
    TB = min(1024, _round_up(max(B, 8), 8))
    B_pad = _round_up(B, TB)
    grid = (B_pad // TB,)

    # bf16 operands (f32 accumulation in-kernel); biases stay f32.
    xb = jnp.pad(x, ((0, B_pad - B), (0, 0))).astype(jnp.bfloat16)
    w1b = w1.astype(jnp.bfloat16)                                       # (784, 512)
    b1f = b1.astype(jnp.float32)                                        # (1, 512)
    w2b = jnp.pad(w2, ((0, 0), (0, H2_PAD - H2))).astype(jnp.bfloat16)  # (512, 128)
    b2f = jnp.pad(b2, ((0, 0), (0, H2_PAD - H2))).astype(jnp.float32)   # (1, 128)
    w3b = jnp.pad(w3, ((0, H2_PAD - H2), (0, OUT_PAD - OUT))).astype(jnp.bfloat16)  # (128, 128)
    b3f = jnp.pad(b3, ((0, 0), (0, OUT_PAD - OUT))).astype(jnp.float32)             # (1, 128)

    const = lambda i: (0, 0)  # weights/biases resident across the grid

    out_padded = pl.pallas_call(
        mlp_kernel,
        out_shape=jax.ShapeDtypeStruct((B_pad, OUT_PAD), jnp.float32),
        grid_spec=pltpu.PrefetchScalarGridSpec(
            num_scalar_prefetch=0,
            grid=grid,
            in_specs=[
                pl.BlockSpec((TB, IN), lambda i: (i, 0)),        # x tile (pipelined)
                pl.BlockSpec((IN, H1), const),                   # w1
                pl.BlockSpec((1, H1), const),                    # b1
                pl.BlockSpec((H1, H2_PAD), const),               # w2 (padded)
                pl.BlockSpec((1, H2_PAD), const),                # b2 (padded)
                pl.BlockSpec((H2_PAD, OUT_PAD), const),          # w3 (padded)
                pl.BlockSpec((1, OUT_PAD), const),               # b3 (padded)
            ],
            out_specs=pl.BlockSpec((TB, OUT_PAD), lambda i: (i, 0)),
        ),
        compiler_params=pltpu.CompilerParams(
            dimension_semantics=("parallel",),                   # 2-TC sharding on v7x
        ),
    )(xb, w1b, b1f, w2b, b2f, w3b, b3f)

    return out_padded[:B, :OUT]


def init_params(key):
    """Deterministic init mimicking PyTorch nn.Linear default:
    U(-1/sqrt(fan_in), 1/sqrt(fan_in)) for weights and biases."""
    sizes = [(IN, H1), (H1, H2), (H2, OUT)]
    params = []
    for i, (fan_in, fan_out) in enumerate(sizes):
        kw, kb = jax.random.split(jax.random.fold_in(key, i))
        bound = 1.0 / jnp.sqrt(fan_in)
        w = jax.random.uniform(kw, (fan_in, fan_out), jnp.float32, -bound, bound)
        b = jax.random.uniform(kb, (1, fan_out), jnp.float32, -bound, bound)
        params += [w, b]
    return tuple(params)


if __name__ == "__main__":
    key = jax.random.PRNGKey(0)
    params = init_params(key)

    # Small batch of flattened 28x28 "images".
    B = 8
    x = jax.random.normal(jax.random.fold_in(key, 100), (B, IN), jnp.float32)

    out = neural_network_forward(x, params)
    out = jax.block_until_ready(out)

    # Sanity check against a plain-JAX f32 reference (same math as the PyTorch
    # module).  Tolerance is relaxed because the kernel uses bf16 operands
    # (with f32 accumulation).
    w1, b1, w2, b2, w3, b3 = params
    ref = jax.nn.sigmoid(jnp.tanh(jnp.tanh(x @ w1 + b1) @ w2 + b2) @ w3 + b3)
    assert out.shape == (B, OUT), out.shape
    max_err = float(jnp.max(jnp.abs(out - ref)))
    assert max_err < 3e-2, f"max abs error {max_err}"

    print("KERNEL_OK")
</pallas_src>

<mosaic_0001>
module attributes {stable_mosaic.version = 11 : i64} {
  func.func @mlp_kernel(%arg0: i32, %arg1: memref<8x784xbf16, #tpu.memory_space<vmem>>, %arg2: memref<784x512xbf16, #tpu.memory_space<vmem>>, %arg3: memref<1x512xf32, #tpu.memory_space<vmem>>, %arg4: memref<512x128xbf16, #tpu.memory_space<vmem>>, %arg5: memref<1x128xf32, #tpu.memory_space<vmem>>, %arg6: memref<128x128xbf16, #tpu.memory_space<vmem>>, %arg7: memref<1x128xf32, #tpu.memory_space<vmem>>, %arg8: memref<8x128xf32, #tpu.memory_space<vmem>>) attributes {dimension_semantics = [#tpu.dimension_semantics<parallel>], iteration_bounds = array<i64: 1>, scalar_prefetch = 0 : i64, scratch_operands = 0 : i64, tpu.core_type = #tpu.core_type<tc>, window_params = [{transform_indices = @transform_0, window_bounds = array<i64: 8, 784>}, {pipeline_mode = #tpu.pipeline_mode<synchronous>, transform_indices = @transform_1, window_bounds = array<i64: 784, 512>}, {pipeline_mode = #tpu.pipeline_mode<synchronous>, transform_indices = @transform_2, window_bounds = array<i64: 1, 512>}, {pipeline_mode = #tpu.pipeline_mode<synchronous>, transform_indices = @transform_3, window_bounds = array<i64: 512, 128>}, {pipeline_mode = #tpu.pipeline_mode<synchronous>, transform_indices = @transform_4, window_bounds = array<i64: 1, 128>}, {pipeline_mode = #tpu.pipeline_mode<synchronous>, transform_indices = @transform_5, window_bounds = array<i64: 128, 128>}, {pipeline_mode = #tpu.pipeline_mode<synchronous>, transform_indices = @transform_6, window_bounds = array<i64: 1, 128>}, {transform_indices = @transform_7, window_bounds = array<i64: 8, 128>}]} {
    %c0 = arith.constant 0 : index
    %c0_0 = arith.constant 0 : index
    %0 = vector.load %arg1[%c0, %c0_0] : memref<8x784xbf16, #tpu.memory_space<vmem>>, vector<8x784xbf16>
    %c0_1 = arith.constant 0 : index
    %c0_2 = arith.constant 0 : index
    %1 = vector.load %arg2[%c0_1, %c0_2] : memref<784x512xbf16, #tpu.memory_space<vmem>>, vector<784x512xbf16>
    %cst = arith.constant dense<0.000000e+00> : vector<8x512xf32>
    %2 = tpu.matmul %0, %1, %cst {dimension_numbers = #tpu.dot_dimension_numbers<[1], [0], [0], [1], [0, 0, 1, 1], [], []>} : vector<8x784xbf16>, vector<784x512xbf16>, vector<8x512xf32> -> vector<8x512xf32>
    %c0_3 = arith.constant 0 : index
    %c0_4 = arith.constant 0 : index
    %3 = vector.load %arg3[%c0_3, %c0_4] : memref<1x512xf32, #tpu.memory_space<vmem>>, vector<1x512xf32>
    %4 = vector.broadcast %3 : vector<1x512xf32> to vector<8x512xf32>
    %5 = arith.addf %2, %4 : vector<8x512xf32>
    %6 = math.tanh %5 : vector<8x512xf32>
    %7 = arith.truncf %6 : vector<8x512xf32> to vector<8x512xbf16>
    %c0_5 = arith.constant 0 : index
    %c0_6 = arith.constant 0 : index
    %8 = vector.load %arg4[%c0_5, %c0_6] : memref<512x128xbf16, #tpu.memory_space<vmem>>, vector<512x128xbf16>
    %cst_7 = arith.constant dense<0.000000e+00> : vector<8x128xf32>
    %9 = tpu.matmul %7, %8, %cst_7 {dimension_numbers = #tpu.dot_dimension_numbers<[1], [0], [0], [1], [0, 0, 1, 1], [], []>} : vector<8x512xbf16>, vector<512x128xbf16>, vector<8x128xf32> -> vector<8x128xf32>
    %c0_8 = arith.constant 0 : index
    %c0_9 = arith.constant 0 : index
    %10 = vector.load %arg5[%c0_8, %c0_9] : memref<1x128xf32, #tpu.memory_space<vmem>>, vector<1x128xf32>
    %11 = vector.broadcast %10 : vector<1x128xf32> to vector<8x128xf32>
    %12 = arith.addf %9, %11 : vector<8x128xf32>
    %13 = math.tanh %12 : vector<8x128xf32>
    %14 = arith.truncf %13 : vector<8x128xf32> to vector<8x128xbf16>
    %c0_10 = arith.constant 0 : index
    %c0_11 = arith.constant 0 : index
    %15 = vector.load %arg6[%c0_10, %c0_11] : memref<128x128xbf16, #tpu.memory_space<vmem>>, vector<128x128xbf16>
    %cst_12 = arith.constant dense<0.000000e+00> : vector<8x128xf32>
    %16 = tpu.matmul %14, %15, %cst_12 {dimension_numbers = #tpu.dot_dimension_numbers<[1], [0], [0], [1], [0, 0, 1, 1], [], []>} : vector<8x128xbf16>, vector<128x128xbf16>, vector<8x128xf32> -> vector<8x128xf32>
    %c0_13 = arith.constant 0 : index
    %c0_14 = arith.constant 0 : index
    %17 = vector.load %arg7[%c0_13, %c0_14] : memref<1x128xf32, #tpu.memory_space<vmem>>, vector<1x128xf32>
    %18 = vector.broadcast %17 : vector<1x128xf32> to vector<8x128xf32>
    %19 = arith.addf %16, %18 : vector<8x128xf32>
    %20 = arith.negf %19 : vector<8x128xf32>
    %21 = math.exp %20 : vector<8x128xf32>
    %cst_15 = arith.constant 1.000000e+00 : f32
    %22 = vector.broadcast %cst_15 : f32 to vector<8x128xf32>
    %23 = arith.addf %22, %21 : vector<8x128xf32>
    %24 = arith.divf %22, %23 : vector<8x128xf32>
    %c0_16 = arith.constant 0 : index
    %c0_17 = arith.constant 0 : index
    %25 = vector.load %arg8[%c0_16, %c0_17] : memref<8x128xf32, #tpu.memory_space<vmem>>, vector<8x128xf32>
    tpu.vector_store %arg8[%c0_16, %c0_17], %24 {strides = array<i32>} : memref<8x128xf32, #tpu.memory_space<vmem>>, vector<8x128xf32>,
    return
  }
  func.func @transform_0(%arg0: i32) -> (i32, i32) {
    %c0_i32 = arith.constant 0 : i32
    %c0_i32_0 = arith.constant 0 : i32
    return %arg0, %c0_i32 : i32, i32
  }
  func.func @transform_1(%arg0: i32) -> (i32, i32) {
    %c0_i32 = arith.constant 0 : i32
    %c0_i32_0 = arith.constant 0 : i32
    %c0_i32_1 = arith.constant 0 : i32
    return %c0_i32, %c0_i32_0 : i32, i32
  }
  func.func @transform_2(%arg0: i32) -> (i32, i32) {
    %c0_i32 = arith.constant 0 : i32
    %c0_i32_0 = arith.constant 0 : i32
    %c0_i32_1 = arith.constant 0 : i32
    return %c0_i32, %c0_i32_0 : i32, i32
  }
  func.func @transform_3(%arg0: i32) -> (i32, i32) {
    %c0_i32 = arith.constant 0 : i32
    %c0_i32_0 = arith.constant 0 : i32
    %c0_i32_1 = arith.constant 0 : i32
    return %c0_i32, %c0_i32_0 : i32, i32
  }
  func.func @transform_4(%arg0: i32) -> (i32, i32) {
    %c0_i32 = arith.constant 0 : i32
    %c0_i32_0 = arith.constant 0 : i32
    %c0_i32_1 = arith.constant 0 : i32
    return %c0_i32, %c0_i32_0 : i32, i32
  }
  func.func @transform_5(%arg0: i32) -> (i32, i32) {
    %c0_i32 = arith.constant 0 : i32
    %c0_i32_0 = arith.constant 0 : i32
    %c0_i32_1 = arith.constant 0 : i32
    return %c0_i32, %c0_i32_0 : i32, i32
  }
  func.func @transform_6(%arg0: i32) -> (i32, i32) {
    %c0_i32 = arith.constant 0 : i32
    %c0_i32_0 = arith.constant 0 : i32
    %c0_i32_1 = arith.constant 0 : i32
    return %c0_i32, %c0_i32_0 : i32, i32
  }
  func.func @transform_7(%arg0: i32) -> (i32, i32) {
    %c0_i32 = arith.constant 0 : i32
    %c0_i32_0 = arith.constant 0 : i32
    return %arg0, %c0_i32 : i32, i32
  }
}

</mosaic_0001>

<bundles_post_ra>
// kernel: tpu_custom_call.1
= control target key start
LH: loop header
LB: loop body
LE: loop exit
PB: predicated region body
PF: predicated region fallthrough
CT: control target
= control target key end

     0   :  { %12 = vsyncpa [#allocation3], 0  ;;  %s3103_s0 = inlined_call_operand.hbm [shape: bf16[8,784], index: 0, kind: input, shape index: {}]   ;;  %s3104_s1 = inlined_call_operand.hbm [shape: bf16[784,512], index: 1, kind: input, shape index: {}]   ;;  %s3105_s2 = inlined_call_operand.vmem [shape: f32[1,512], index: 2, kind: input, shape index: {}]   ;;  %s3106_s3 = inlined_call_operand.hbm [shape: bf16[512,128], index: 3, kind: input, shape index: {}]   ;;  %s3107_s4 = inlined_call_operand.vmem [shape: f32[1,128], index: 4, kind: input, shape index: {}]   ;;  %s3108_s5 = inlined_call_operand.hbm [shape: bf16[128,128], index: 5, kind: input, shape index: {}]   ;;  %s3109_s6 = inlined_call_operand.vmem [shape: f32[1,128], index: 6, kind: input, shape index: {}]   ;;  %s3110_s7 = inlined_call_operand.hbm [shape: f32[8,128], index: 7, kind: output, shape index: {}]  }
   0x1   :  { %13 = vsyncpa [#allocation6], 0 }
   0x2   :  { %14 = vsyncpa [#allocation9], 0 }
   0x3   :  { %15 = vsyncpa [#allocation4], 0  ;;  %s2960_s24 = smov [#allocation5]   ;;  %s2842_s28 = scalar_lea.hbm %s3104_s1, 25088 }
   0x4   :  { %s31_s25 = sshll.u32 %s2960_s24, 4  ;;  %p2843_p0 = scmp.ne.s32.totalorder %s3104_s1, %s2842_s28  ;;  %s32_s25 = int_to_ptr.vmem [resolvable:$true] %s31_s25 }
   0x5   :  { %p2846_p1 = scmp.lt.u32.totalorder %s2842_s28, %s3104_s1 }
   0x7   :  { %p2848_p2 = pnand %p2846_p1, %p2843_p0 }
   0x9   :  { %2851 = shalt.err (!%p2848_p2)
}
   0xa   :  { %s2852_s10 = scalar_lea.vmem %s32_s25, 25088  ;;  %p2857_p4 = scmp.lt.s32.totalorder %s32_s25, %s32_s25 }
   0xb   :  { %p2853_p3 = scmp.ne.s32.totalorder %s32_s25, %s2852_s10  ;;  %p2858_p5 = scmp.lt.s32.totalorder %s2852_s10, %s2852_s10 }
   0xd   :  { %p2859_p6 = por %p2858_p5, %p2857_p4 }
   0xf   :  { %p2860_p7 = pnand %p2859_p6, %p2853_p3 }
  0x11   :  { %2863 = shalt.err (!%p2860_p7)
}
  0x12   :  { %s2961_s11 = smov 256   ;;  %s2962_s12 = smov 16  }
  0x13   :  { %37 = dma.hbm_to_vmem [thread:$0]  %s3104_s1, 25088, %s32_s25, [#allocation6], %s2961_s11, %s2961_s11, %s2962_s12  }
  0x14   :  { %s2963_s15 = smov [#allocation2]   ;;  %s2964_s17 = smov [#allocation7]  }
  0x15   :  { %s22_s16 = sshll.u32 %s2963_s15, 4  ;;  %s45_s18 = sshll.u32 %s2964_s17, 4  ;;  %s23_s16 = int_to_ptr.vmem [resolvable:$true] %s22_s16  ;;  %s46_s18 = int_to_ptr.vmem [resolvable:$true] %s45_s18 }
  0x16   :  { %s2864_s21 = scalar_lea.hbm %s3103_s0, 448 }
  0x17   :  { %p2865_p8 = scmp.ne.s32.totalorder %s3103_s0, %s2864_s21  ;;  %p2868_p9 = scmp.lt.u32.totalorder %s2864_s21, %s3103_s0 }
  0x19   :  { %p2870_p10 = pnand %p2868_p9, %p2865_p8 }
  0x1b   :  { %2873 = shalt.err (!%p2870_p10)
}
  0x1c   :  { %s2874_s1 = scalar_lea.vmem %s23_s16, 448  ;;  %p2879_p12 = scmp.lt.s32.totalorder %s23_s16, %s23_s16 }
  0x1d   :  { %p2875_p11 = scmp.ne.s32.totalorder %s23_s16, %s2874_s1  ;;  %p2880_p13 = scmp.lt.s32.totalorder %s2874_s1, %s2874_s1 }
  0x1f   :  { %p2881_p0 = por %p2880_p13, %p2879_p12 }
  0x21   :  { %p2882_p1 = pnand %p2881_p0, %p2875_p11 }
  0x23   :  { %2885 = shalt.err (!%p2882_p1)
}
  0x24   :  { %25 = dma.hbm_to_vmem [thread:$0]  %s3103_s0, 448, %s23_s16, [#allocation3]  }
  0x25   :  { %s2886_s30 = scalar_lea.hbm %s3106_s3, 4096 }
  0x26   :  { %p2887_p2 = scmp.ne.s32.totalorder %s3106_s3, %s2886_s30  ;;  %p2890_p3 = scmp.lt.u32.totalorder %s2886_s30, %s3106_s3 }
  0x28   :  { %p2892_p4 = pnand %p2890_p3, %p2887_p2 }
  0x2a   :  { %2895 = shalt.err (!%p2892_p4)
}
  0x2b   :  { %s2896_s12 = scalar_lea.vmem %s46_s18, 4096  ;;  %p2901_p6 = scmp.lt.s32.totalorder %s46_s18, %s46_s18 }
  0x2c   :  { %p2897_p5 = scmp.ne.s32.totalorder %s46_s18, %s2896_s12  ;;  %p2902_p7 = scmp.lt.s32.totalorder %s2896_s12, %s2896_s12 }
  0x2e   :  { %p2903_p8 = por %p2902_p7, %p2901_p6 }
  0x30   :  { %p2904_p9 = pnand %p2903_p8, %p2897_p5 }
  0x32   :  { %2907 = shalt.err (!%p2904_p9)
}
  0x33   :  { %s2965_s0 = smov 64   ;;  %s2966_s13 = smov 4  }
  0x34   :  { %51 = dma.hbm_to_vmem [thread:$0]  %s3106_s3, 4096, %s46_s18, [#allocation6], %s2965_s0, %s2965_s0, %s2966_s13  }
  0x35   :  { %s2967_s16 = smov [#allocation8]   ;;  %s2908_s21 = scalar_lea.hbm %s3108_s5, 1024 }
  0x36   :  { %s59_s17 = sshll.u32 %s2967_s16, 4  ;;  %p2909_p10 = scmp.ne.s32.totalorder %s3108_s5, %s2908_s21  ;;  %s60_s17 = int_to_ptr.vmem [resolvable:$true] %s59_s17 }
  0x37   :  { %p2912_p11 = scmp.lt.u32.totalorder %s2908_s21, %s3108_s5 }
  0x39   :  { %p2914_p12 = pnand %p2912_p11, %p2909_p10 }
  0x3b   :  { %2917 = shalt.err (!%p2914_p12)
}
  0x3c   :  { %s2918_s1 = scalar_lea.vmem %s60_s17, 1024  ;;  %p2923_p0 = scmp.lt.s32.totalorder %s60_s17, %s60_s17 }
  0x3d   :  { %p2919_p13 = scmp.ne.s32.totalorder %s60_s17, %s2918_s1  ;;  %p2924_p1 = scmp.lt.s32.totalorder %s2918_s1, %s2918_s1 }
  0x3f   :  { %p2925_p2 = por %p2924_p1, %p2923_p0 }
  0x41   :  { %p2926_p3 = pnand %p2925_p2, %p2919_p13 }
  0x43   :  { %2929 = shalt.err (!%p2926_p3)
}
  0x44   :  { %65 = dma.hbm_to_vmem [thread:$0]  %s3108_s5, 1024, %s60_s17, [#allocation9], %s2965_s0, %s2965_s0, %s2966_s13  }
  0x45   :  { %2952 = dma.done.wait [#allocation3], 448  }
  0x46   :  { %2953 = vsyncadd [#allocation3], 4294966848 }
  0x47   :  { %2954 = dma.done.wait [#allocation6], 29184  }
  0x48   :  { %2955 = vsyncadd [#allocation6], 4294938112 }
  0x49   :  { %2956 = dma.done.wait [#allocation9], 1024  }
  0x4a   :  { %2957 = vsyncadd [#allocation9], 4294966272  ;;  %v2968_v0 = vmov 0   ;;  %v2486_v1 = vld [vmem:[#allocation5 + $0x4] ss:$16 sps:$4 sm:$0xff]   ;;  %vm1307_vm0 = vcmask 130048  }
  0x4b   :  { %1466 = vmatprep.mubr.bf16.mxu1 %v2968_v0  ;;  %v2488_v2 = vld [vmem:[#allocation5 + $0x604] ss:$16 sps:$4 sm:$0xff]   ;;  %1311 = vmatprep.subr.bf16.mxu0 %v2486_v1  ;;  %v2490_v3 = vld [vmem:[#allocation5] ss:$16 sps:$4 sm:$0xff]   ;;  %v2494_v6 = vld [vmem:[#allocation2 + $0x18] ss:$0 sps:$4 sm:$0xff]  }
  0x4c   :  { %v2491_v4 = vld [vmem:[#allocation5 + $0x600] ss:$16 sps:$4 sm:$0xff]   ;;  %1434 = vmatprep.subr.bf16.mxu1 %v2488_v2  ;;  %v2492_v5 = vld [vmem:[#allocation5 + $0x24] ss:$16 sps:$4 sm:$0xff]   ;;  %1312 = vmatpush1.bf16.msra.mxu0 %v2490_v3  ;;  %v2495_v7 = vld [vmem:[#allocation5 + $0x8] ss:$16 sps:$4 sm:$0xff]  }
  0x4d   :  { %1435 = vmatpush1.bf16.msra.mxu1 %v2491_v4  ;;  %1313 = vmatprep.subr.bf16.mxu0 %v2492_v5  ;;  %v2497_v8 = vld [vmem:[#allocation5 + $0xc] ss:$16 sps:$4 sm:$0xff]   ;;  %v2498_v9 = vld [vmem:[#allocation5 + $0x20] ss:$16 sps:$4 sm:$0xff]   ;;  %v2499_v10 = vld [vmem:[#allocation5 + $0x44] ss:$16 sps:$4 sm:$0xff]  }
  0x4e   :  { %1475 = vmatprep.subr.bf16.mxu1 %v2497_v8  ;;  %v2501_v11 = vld [vmem:[#allocation5 + $0x28] ss:$16 sps:$4 sm:$0xff]   ;;  %v2503_v12 = vld [vmem:[#allocation5 + $0x2c] ss:$16 sps:$4 sm:$0xff]   ;;  %v2504_v13 = vld [vmem:[#allocation5 + $0x40] ss:$16 sps:$4 sm:$0xff]  }
  0x4f   :  { %v2505_v14 = vld [vmem:[#allocation5 + $0x64] ss:$16 sps:$4 sm:$0xff]   ;;  %v2509_v15 = vld [vmem:[#allocation5 + $0x4c] ss:$16 sps:$4 sm:$0xff]   ;;  %v2507_v16 = vld [vmem:[#allocation5 + $0x48] ss:$16 sps:$4 sm:$0xff]  }
  0x50   :  { %2330 = vmatmul.mubr.msk.bf16.vlgmr.msra.gmra.mrb[0].mxu1 %vm1307_vm0, %v2494_v6  ;;  %1314 = vmatpush1.bf16.msra.mxu0 %v2498_v9  ;;  %v2510_v17 = vld [vmem:[#allocation5 + $0x60] ss:$16 sps:$4 sm:$0xff]   ;;  %v2511_v18 = vld [vmem:[#allocation5 + $0x84] ss:$16 sps:$4 sm:$0xff]   ;;  %v2515_v19 = vld [vmem:[#allocation5 + $0x6c] ss:$16 sps:$4 sm:$0xff]  }
  0x51   :  { %1476 = vmatpush1.bf16.msra.mxu1 %v2495_v7  ;;  %1315 = vmatprep.subr.bf16.mxu0 %v2499_v10  ;;  %v2513_v20 = vld [vmem:[#allocation5 + $0x68] ss:$16 sps:$4 sm:$0xff]   ;;  %v2516_v21 = vld [vmem:[#allocation5 + $0x80] ss:$16 sps:$4 sm:$0xff]   ;;  %v2517_v22 = vld [vmem:[#allocation5 + $0xa4] ss:$16 sps:$4 sm:$0xff]  }
  0x52   :  { %1477 = vmatprep.subr.bf16.mxu1 %v2503_v12  ;;  %v2521_v23 = vld [vmem:[#allocation5 + $0x8c] ss:$16 sps:$4 sm:$0xff]   ;;  %v2519_v24 = vld [vmem:[#allocation5 + $0x88] ss:$16 sps:$4 sm:$0xff]   ;;  %v2522_v25 = vld [vmem:[#allocation5 + $0xa0] ss:$16 sps:$4 sm:$0xff]  }
  0x53   :  { %v2523_v26 = vld [vmem:[#allocation5 + $0xc4] ss:$16 sps:$4 sm:$0xff]   ;;  %v2527_v27 = vld [vmem:[#allocation5 + $0xac] ss:$16 sps:$4 sm:$0xff]   ;;  %v2525_v28 = vld [vmem:[#allocation5 + $0xa8] ss:$16 sps:$4 sm:$0xff]  }
  0x54   :  { %1316 = vmatpush1.bf16.msra.mxu0 %v2504_v13  ;;  %v2528_v29 = vld [vmem:[#allocation5 + $0xc0] ss:$16 sps:$4 sm:$0xff]   ;;  %v2529_v30 = vld [vmem:[#allocation5 + $0xe4] ss:$16 sps:$4 sm:$0xff]   ;;  %v2533_v31 = vld [vmem:[#allocation5 + $0xcc] ss:$16 sps:$4 sm:$0xff]  }
  0x55   :  { %1478 = vmatpush1.bf16.msra.mxu1 %v2501_v11  ;;  %1317 = vmatprep.subr.bf16.mxu0 %v2505_v14  ;;  %v2531_v32 = vld [vmem:[#allocation5 + $0xc8] ss:$16 sps:$4 sm:$0xff]   ;;  %v2534_v33 = vld [vmem:[#allocation5 + $0xe0] ss:$16 sps:$4 sm:$0xff]   ;;  %v2535_v34 = vld [vmem:[#allocation5 + $0x104] ss:$16 sps:$4 sm:$0xff]  }
  0x56   :  { %1479 = vmatprep.subr.bf16.mxu1 %v2509_v15  ;;  %v2539_v35 = vld [vmem:[#allocation5 + $0xec] ss:$16 sps:$4 sm:$0xff]   ;;  %v2537_v36 = vld [vmem:[#allocation5 + $0xe8] ss:$16 sps:$4 sm:$0xff]   ;;  %v2540_v37 = vld [vmem:[#allocation5 + $0x100] ss:$16 sps:$4 sm:$0xff]  }
  0x57   :  { %v2541_v38 = vld [vmem:[#allocation5 + $0x124] ss:$16 sps:$4 sm:$0xff]   ;;  %v2545_v39 = vld [vmem:[#allocation5 + $0x10c] ss:$16 sps:$4 sm:$0xff]   ;;  %v2543_v40 = vld [vmem:[#allocation5 + $0x108] ss:$16 sps:$4 sm:$0xff]  }
  0x58   :  { %1318 = vmatpush1.bf16.msra.mxu0 %v2510_v17  ;;  %v2546_v41 = vld [vmem:[#allocation5 + $0x120] ss:$16 sps:$4 sm:$0xff]   ;;  %v2547_v42 = vld [vmem:[#allocation5 + $0x144] ss:$16 sps:$4 sm:$0xff]   ;;  %v2551_v43 = vld [vmem:[#allocation5 + $0x12c] ss:$16 sps:$4 sm:$0xff]  }
  0x59   :  { %1480 = vmatpush1.bf16.msra.mxu1 %v2507_v16  ;;  %1319 = vmatprep.subr.bf16.mxu0 %v2511_v18  ;;  %v2549_v44 = vld [vmem:[#allocation5 + $0x128] ss:$16 sps:$4 sm:$0xff]   ;;  %v2552_v45 = vld [vmem:[#allocation5 + $0x140] ss:$16 sps:$4 sm:$0xff]   ;;  %v2553_v46 = vld [vmem:[#allocation5 + $0x164] ss:$16 sps:$4 sm:$0xff]  }
  0x5a   :  { %1481 = vmatprep.subr.bf16.mxu1 %v2515_v19  ;;  %v2557_v47 = vld [vmem:[#allocation5 + $0x14c] ss:$16 sps:$4 sm:$0xff]   ;;  %v2555_v48 = vld [vmem:[#allocation5 + $0x148] ss:$16 sps:$4 sm:$0xff]   ;;  %v2558_v50 = vld [vmem:[#allocation5 + $0x160] ss:$16 sps:$4 sm:$0xff]  }
  0x5b   :  { %v81_v49 = vld [vmem:[#allocation2] sm:$0xff]  ;;  %v2563_v53 = vld [vmem:[#allocation5 + $0x16c] ss:$16 sps:$4 sm:$0xff]   ;;  %v2564_v55 = vld [vmem:[#allocation5 + $0x180] ss:$16 sps:$4 sm:$0xff]   ;;  %vm2970_vm1 = vmmov 0  }
  0x5c   :  { %1320 = vmatpush1.bf16.msra.mxu0 %v2516_v21  ;;  %v2559_v51 = vld [vmem:[#allocation5 + $0x184] ss:$16 sps:$4 sm:$0xff]   ;;  %v2128_v52 = vcombine.high %v81_v49, %v81_v49  ;;  %v2561_v54 = vld [vmem:[#allocation5 + $0x168] ss:$16 sps:$4 sm:$0xff]   ;;  %v2569_v57 = vld [vmem:[#allocation5 + $0x18c] ss:$16 sps:$4 sm:$0xff]   ;;  %v2127_v7 = vcombine.low %v81_v49, %v81_v49 }
  0x5d   :  { %1482 = vmatpush1.bf16.msra.mxu1 %v2513_v20  ;;  %1321 = vmatprep.subr.bf16.mxu0 %v2517_v22  ;;  %v2565_v56 = vld [vmem:[#allocation5 + $0x1a4] ss:$16 sps:$4 sm:$0xff]   ;;  %v2567_v58 = vld [vmem:[#allocation5 + $0x188] ss:$16 sps:$4 sm:$0xff]   ;;  %v2570_v59 = vld [vmem:[#allocation5 + $0x1a0] ss:$16 sps:$4 sm:$0xff]  }
  0x5e   :  { %1483 = vmatprep.subr.bf16.mxu1 %v2521_v23  ;;  %1343 = vmatprep.mubr.bf16.mxu0 %v2128_v52  ;;  %v2571_v60 = vld [vmem:[#allocation5 + $0x1c4] ss:$16 sps:$4 sm:$0xff]   ;;  %v2575_v61 = vld [vmem:[#allocation5 + $0x1ac] ss:$16 sps:$4 sm:$0xff]   ;;  %v2573_v62 = vld [vmem:[#allocation5 + $0x1a8] ss:$16 sps:$4 sm:$0xff]  }
  0x5f   :  { %1507 = vmatprep.mubr.bf16.mxu1 %v2128_v52  ;;  %v2576_v63 = vld [vmem:[#allocation5 + $0x1c0] ss:$16 sps:$4 sm:$0xff]   ;;  %v2577_v1 = vld [vmem:[#allocation5 + $0x1e4] ss:$16 sps:$4 sm:$0xff]   ;;  %v2581_v2 = vld [vmem:[#allocation5 + $0x1cc] ss:$16 sps:$4 sm:$0xff]  }
  0x60   :  { %1322 = vmatpush1.bf16.msra.mxu0 %v2522_v25  ;;  %v2579_v3 = vld [vmem:[#allocation5 + $0x1c8] ss:$16 sps:$4 sm:$0xff]   ;;  %v2582_v4 = vld [vmem:[#allocation5 + $0x1e0] ss:$16 sps:$4 sm:$0xff]   ;;  %v2587_v5 = vld [vmem:[#allocation5 + $0x204] ss:$16 sps:$4 sm:$0xff]  }
  0x61   :  { %1484 = vmatpush1.bf16.msra.mxu1 %v2519_v24  ;;  %1323 = vmatprep.subr.bf16.mxu0 %v2523_v26  ;;  %v2590_v6 = vld [vmem:[#allocation5 + $0x1ec] ss:$16 sps:$4 sm:$0xff]   ;;  %v2585_v8 = vld [vmem:[#allocation5 + $0x200] ss:$16 sps:$4 sm:$0xff]   ;;  %v2588_v9 = vld [vmem:[#allocation5 + $0x1e8] ss:$16 sps:$4 sm:$0xff]  }
  0x62   :  { %1485 = vmatprep.subr.bf16.mxu1 %v2527_v27  ;;  %v2593_v10 = vld [vmem:[#allocation5 + $0x224] ss:$16 sps:$4 sm:$0xff]   ;;  %v2596_v11 = vld [vmem:[#allocation5 + $0x20c] ss:$16 sps:$4 sm:$0xff]   ;;  %v2591_v12 = vld [vmem:[#allocation5 + $0x220] ss:$16 sps:$4 sm:$0xff]  }
  0x63   :  { %v2594_v13 = vld [vmem:[#allocation5 + $0x208] ss:$16 sps:$4 sm:$0xff]   ;;  %v2599_v14 = vld [vmem:[#allocation5 + $0x244] ss:$16 sps:$4 sm:$0xff]   ;;  %v2602_v15 = vld [vmem:[#allocation5 + $0x22c] ss:$16 sps:$4 sm:$0xff]  }
  0x64   :  { %1324 = vmatpush1.bf16.msra.mxu0 %v2528_v29  ;;  %v2597_v16 = vld [vmem:[#allocation5 + $0x240] ss:$16 sps:$4 sm:$0xff]   ;;  %v2600_v17 = vld [vmem:[#allocation5 + $0x228] ss:$16 sps:$4 sm:$0xff]   ;;  %v2605_v18 = vld [vmem:[#allocation5 + $0x264] ss:$16 sps:$4 sm:$0xff]  }
  0x65   :  { %1486 = vmatpush1.bf16.msra.mxu1 %v2525_v28  ;;  %1325 = vmatprep.subr.bf16.mxu0 %v2529_v30  ;;  %v2608_v19 = vld [vmem:[#allocation5 + $0x24c] ss:$16 sps:$4 sm:$0xff]   ;;  %v2603_v20 = vld [vmem:[#allocation5 + $0x260] ss:$16 sps:$4 sm:$0xff]   ;;  %v2606_v21 = vld [vmem:[#allocation5 + $0x248] ss:$16 sps:$4 sm:$0xff]  }
  0x66   :  { %1487 = vmatprep.subr.bf16.mxu1 %v2533_v31  ;;  %v2611_v22 = vld [vmem:[#allocation5 + $0x284] ss:$16 sps:$4 sm:$0xff]   ;;  %v2614_v23 = vld [vmem:[#allocation5 + $0x26c] ss:$16 sps:$4 sm:$0xff]   ;;  %v2609_v24 = vld [vmem:[#allocation5 + $0x280] ss:$16 sps:$4 sm:$0xff]  }
  0x67   :  { %v2612_v25 = vld [vmem:[#allocation5 + $0x268] ss:$16 sps:$4 sm:$0xff]   ;;  %v2617_v26 = vld [vmem:[#allocation5 + $0x2a4] ss:$16 sps:$4 sm:$0xff]   ;;  %v2620_v27 = vld [vmem:[#allocation5 + $0x28c] ss:$16 sps:$4 sm:$0xff]  }
  0x68   :  { %1326 = vmatpush1.bf16.msra.mxu0 %v2534_v33  ;;  %v2615_v28 = vld [vmem:[#allocation5 + $0x2a0] ss:$16 sps:$4 sm:$0xff]   ;;  %v2618_v29 = vld [vmem:[#allocation5 + $0x288] ss:$16 sps:$4 sm:$0xff]   ;;  %v2623_v30 = vld [vmem:[#allocation5 + $0x2c4] ss:$16 sps:$4 sm:$0xff]  }
  0x69   :  { %1488 = vmatpush1.bf16.msra.mxu1 %v2531_v32  ;;  %1327 = vmatprep.subr.bf16.mxu0 %v2535_v34  ;;  %v2626_v31 = vld [vmem:[#allocation5 + $0x2ac] ss:$16 sps:$4 sm:$0xff]   ;;  %v2621_v33 = vld [vmem:[#allocation5 + $0x2c0] ss:$16 sps:$4 sm:$0xff]   ;;  %v2624_v34 = vld [vmem:[#allocation5 + $0x2a8] ss:$16 sps:$4 sm:$0xff]  }
  0x6a   :  { %1489 = vmatprep.subr.bf16.mxu1 %v2539_v35  ;;  %v3062_v32 = vld [vmem:[#allocation2 + $0x8] sm:$0xff]  ;;  %v2653_v52 = vld [vmem:[#allocation5 + $0x364] ss:$16 sps:$4 sm:$0xff]  }
  0x6b   :  { %v2130_v35 = vcombine.high %v3062_v32, %v3062_v32  ;;  %v2650_v49 = vld [vmem:[#allocation5 + $0x32c] ss:$16 sps:$4 sm:$0xff]  }
  0x6c   :  { %1328 = vmatpush1.bf16.msra.mxu0 %v2540_v37  ;;  %v2632_v37 = vld [vmem:[#allocation5 + $0x2cc] ss:$16 sps:$4 sm:$0xff]  }
  0x6d   :  { %1490 = vmatpush1.bf16.msra.mxu1 %v2537_v36  ;;  %1329 = vmatprep.subr.bf16.mxu0 %v2541_v38  ;;  %v2629_v36 = vld [vmem:[#allocation5 + $0x2e4] ss:$16 sps:$4 sm:$0xff]   ;;  %v2627_v38 = vld [vmem:[#allocation5 + $0x2e0] ss:$16 sps:$4 sm:$0xff]  }
  0x6e   :  { %1491 = vmatprep.subr.bf16.mxu1 %v2545_v39  ;;  %v2630_v39 = vld [vmem:[#allocation5 + $0x2c8] ss:$16 sps:$4 sm:$0xff]  }
  0x70   :  { %1330 = vmatpush1.bf16.msra.mxu0 %v2546_v41  ;;  %v2638_v41 = vld [vmem:[#allocation5 + $0x2ec] ss:$16 sps:$4 sm:$0xff]  }
  0x71   :  { %1492 = vmatpush1.bf16.msra.mxu1 %v2543_v40  ;;  %1331 = vmatprep.subr.bf16.mxu0 %v2547_v42  ;;  %v2635_v40 = vld [vmem:[#allocation5 + $0x304] ss:$16 sps:$4 sm:$0xff]   ;;  %v2633_v42 = vld [vmem:[#allocation5 + $0x300] ss:$16 sps:$4 sm:$0xff]  }
  0x72   :  { %1493 = vmatprep.subr.bf16.mxu1 %v2551_v43  ;;  %v2636_v43 = vld [vmem:[#allocation5 + $0x2e8] ss:$16 sps:$4 sm:$0xff]  }
  0x74   :  { %1332 = vmatpush1.bf16.msra.mxu0 %v2552_v45  ;;  %v2644_v45 = vld [vmem:[#allocation5 + $0x30c] ss:$16 sps:$4 sm:$0xff]  }
  0x75   :  { %1494 = vmatpush1.bf16.msra.mxu1 %v2549_v44  ;;  %1333 = vmatprep.subr.bf16.mxu0 %v2553_v46  ;;  %v2641_v44 = vld [vmem:[#allocation5 + $0x324] ss:$16 sps:$4 sm:$0xff]   ;;  %v2639_v46 = vld [vmem:[#allocation5 + $0x320] ss:$16 sps:$4 sm:$0xff]  }
  0x76   :  { %1495 = vmatprep.subr.bf16.mxu1 %v2557_v47  ;;  %v2642_v47 = vld [vmem:[#allocation5 + $0x308] ss:$16 sps:$4 sm:$0xff]  }
  0x78   :  { %1334 = vmatpush1.bf16.msra.mxu0 %v2558_v50  ;;  %v2645_v50 = vld [vmem:[#allocation5 + $0x340] ss:$16 sps:$4 sm:$0xff]  }
  0x79   :  { %1496 = vmatpush1.bf16.msra.mxu1 %v2555_v48  ;;  %1335 = vmatprep.subr.bf16.mxu0 %v2559_v51  ;;  %v2647_v48 = vld [vmem:[#allocation5 + $0x344] ss:$16 sps:$4 sm:$0xff]   ;;  %v2648_v51 = vld [vmem:[#allocation5 + $0x328] ss:$16 sps:$4 sm:$0xff]  }
  0x7a   :  { %1497 = vmatprep.subr.bf16.mxu1 %v2563_v53  ;;  %v2656_v53 = vld [vmem:[#allocation5 + $0x34c] ss:$16 sps:$4 sm:$0xff]  }
  0x7c   :  { %1336 = vmatpush1.bf16.msra.mxu0 %v2564_v55  ;;  %v2654_v55 = vld [vmem:[#allocation5 + $0x348] ss:$16 sps:$4 sm:$0xff]  }
  0x7d   :  { %1498 = vmatpush1.bf16.msra.mxu1 %v2561_v54  ;;  %1337 = vmatprep.subr.bf16.mxu0 %v2565_v56  ;;  %v2651_v54 = vld [vmem:[#allocation5 + $0x360] ss:$16 sps:$4 sm:$0xff]   ;;  %v2659_v56 = vld [vmem:[#allocation5 + $0x384] ss:$16 sps:$4 sm:$0xff]  }
  0x7e   :  { %1499 = vmatprep.subr.bf16.mxu1 %v2569_v57  ;;  %v2662_v57 = vld [vmem:[#allocation5 + $0x36c] ss:$16 sps:$4 sm:$0xff]  }
  0x80   :  { %1338 = vmatpush1.bf16.msra.mxu0 %v2570_v59  ;;  %v2660_v59 = vld [vmem:[#allocation5 + $0x368] ss:$16 sps:$4 sm:$0xff]  }
  0x81   :  { %1500 = vmatpush1.bf16.msra.mxu1 %v2567_v58  ;;  %1339 = vmatprep.subr.bf16.mxu0 %v2571_v60  ;;  %v2657_v58 = vld [vmem:[#allocation5 + $0x380] ss:$16 sps:$4 sm:$0xff]   ;;  %v2665_v60 = vld [vmem:[#allocation5 + $0x3a4] ss:$16 sps:$4 sm:$0xff]  }
  0x82   :  { %1501 = vmatprep.subr.bf16.mxu1 %v2575_v61  ;;  %v2668_v61 = vld [vmem:[#allocation5 + $0x38c] ss:$16 sps:$4 sm:$0xff]  }
  0x84   :  { %1340 = vmatpush1.bf16.msra.mxu0 %v2576_v63  ;;  %v2666_v63 = vld [vmem:[#allocation5 + $0x388] ss:$16 sps:$4 sm:$0xff]  }
  0x85   :  { %1502 = vmatpush1.bf16.msra.mxu1 %v2573_v62  ;;  %1341 = vmatprep.subr.bf16.mxu0 %v2577_v1  ;;  %v2663_v62 = vld [vmem:[#allocation5 + $0x3a0] ss:$16 sps:$4 sm:$0xff]   ;;  %v2671_v1 = vld [vmem:[#allocation5 + $0x3c4] ss:$16 sps:$4 sm:$0xff]  }
  0x86   :  { %1503 = vmatprep.subr.bf16.mxu1 %v2581_v2  ;;  %v2674_v2 = vld [vmem:[#allocation5 + $0x3ac] ss:$16 sps:$4 sm:$0xff]  }
  0x88   :  { %1342 = vmatpush1.bf16.msra.mxu0 %v2582_v4  ;;  %v2672_v4 = vld [vmem:[#allocation5 + $0x3a8] ss:$16 sps:$4 sm:$0xff]  }
  0x89   :  { %1504 = vmatpush1.bf16.msra.mxu1 %v2579_v3  ;;  %1352 = vmatprep.subr.bf16.mxu0 %v2587_v5  ;;  %v2669_v3 = vld [vmem:[#allocation5 + $0x3c0] ss:$16 sps:$4 sm:$0xff]   ;;  %v2677_v5 = vld [vmem:[#allocation5 + $0x3e4] ss:$16 sps:$4 sm:$0xff]  }
  0x8a   :  { %1505 = vmatprep.subr.bf16.mxu1 %v2590_v6  ;;  %v2680_v6 = vld [vmem:[#allocation5 + $0x3cc] ss:$16 sps:$4 sm:$0xff]  }
  0x8b   :  { %1344 = vmatmul.mubr.bf16.vlgmr.msra.gmra.mrb[0].mxu0 %v2127_v7 }
  0x8c   :  { %1353 = vmatpush1.bf16.msra.mxu0 %v2585_v8  ;;  %1384 = vmatprep.mubr.bf16.mxu0 %v2130_v35  ;;  %v2678_v8 = vld [vmem:[#allocation5 + $0x3c8] ss:$16 sps:$4 sm:$0xff]  }
  0x8d   :  { %1506 = vmatpush1.bf16.msra.mxu1 %v2588_v9  ;;  %1354 = vmatprep.subr.bf16.mxu0 %v2593_v10  ;;  %v2685_v9 = vld [vmem:[#allocation5 + $0x404] ss:$16 sps:$4 sm:$0xff]   ;;  %v2688_v10 = vld [vmem:[#allocation5 + $0x3ec] ss:$16 sps:$4 sm:$0xff]  }
  0x8e   :  { %1516 = vmatprep.subr.bf16.mxu1 %v2596_v11  ;;  %v2129_v11 = vcombine.low %v3062_v32, %v3062_v32  ;;  %v2715_v32 = vld [vmem:[#allocation5 + $0x4a4] ss:$16 sps:$4 sm:$0xff]  }
  0x90   :  { %1508 = vmatmul.mubr.bf16.vlgmr.msra.gmra.mrb[4].mxu1 %v2127_v7  ;;  %1355 = vmatpush1.bf16.msra.mxu0 %v2591_v12  ;;  %v2675_v7 = vld [vmem:[#allocation5 + $0x3e0] ss:$16 sps:$4 sm:$0xff]  }
  0x91   :  { %1517 = vmatpush1.bf16.msra.mxu1 %v2594_v13  ;;  %1356 = vmatprep.subr.bf16.mxu0 %v2599_v14  ;;  %v2683_v12 = vld [vmem:[#allocation5 + $0x400] ss:$16 sps:$4 sm:$0xff]   ;;  %v2686_v13 = vld [vmem:[#allocation5 + $0x3e8] ss:$16 sps:$4 sm:$0xff]   ;;  %v2691_v14 = vld [vmem:[#allocation5 + $0x424] ss:$16 sps:$4 sm:$0xff]  }
  0x92   :  { %1518 = vmatprep.subr.bf16.mxu1 %v2602_v15  ;;  %1548 = vmatprep.mubr.bf16.mxu1 %v2130_v35  ;;  %v2694_v15 = vld [vmem:[#allocation5 + $0x40c] ss:$16 sps:$4 sm:$0xff]   ;;  %v2716_v35 = vld [vmem:[#allocation5 + $0x488] ss:$16 sps:$4 sm:$0xff]  }
  0x94   :  { %1357 = vmatpush1.bf16.msra.mxu0 %v2597_v16  ;;  %v3068_v16 = vld [vmem:[#allocation2 + $0x10] sm:$0xff] }
  0x95   :  { %1519 = vmatpush1.bf16.msra.mxu1 %v2600_v17  ;;  %1358 = vmatprep.subr.bf16.mxu0 %v2605_v18  ;;  %v2689_v17 = vld [vmem:[#allocation5 + $0x420] ss:$16 sps:$4 sm:$0xff]   ;;  %v2132_v18 = vcombine.high %v3068_v16, %v3068_v16 }
  0x96   :  { %1520 = vmatprep.subr.bf16.mxu1 %v2608_v19  ;;  %v2692_v19 = vld [vmem:[#allocation5 + $0x408] ss:$16 sps:$4 sm:$0xff]  }
  0x98   :  { %1359 = vmatpush1.bf16.msra.mxu0 %v2603_v20  ;;  %v2697_v20 = vld [vmem:[#allocation5 + $0x444] ss:$16 sps:$4 sm:$0xff]  }
  0x99   :  { %1521 = vmatpush1.bf16.msra.mxu1 %v2606_v21  ;;  %1360 = vmatprep.subr.bf16.mxu0 %v2611_v22  ;;  %v2700_v21 = vld [vmem:[#allocation5 + $0x42c] ss:$16 sps:$4 sm:$0xff]   ;;  %v2695_v22 = vld [vmem:[#allocation5 + $0x440] ss:$16 sps:$4 sm:$0xff]  }
  0x9a   :  { %1522 = vmatprep.subr.bf16.mxu1 %v2614_v23  ;;  %v2698_v23 = vld [vmem:[#allocation5 + $0x428] ss:$16 sps:$4 sm:$0xff]  }
  0x9c   :  { %1361 = vmatpush1.bf16.msra.mxu0 %v2609_v24  ;;  %v2703_v24 = vld [vmem:[#allocation5 + $0x464] ss:$16 sps:$4 sm:$0xff]  }
  0x9d   :  { %1523 = vmatpush1.bf16.msra.mxu1 %v2612_v25  ;;  %1362 = vmatprep.subr.bf16.mxu0 %v2617_v26  ;;  %v2706_v25 = vld [vmem:[#allocation5 + $0x44c] ss:$16 sps:$4 sm:$0xff]   ;;  %v2701_v26 = vld [vmem:[#allocation5 + $0x460] ss:$16 sps:$4 sm:$0xff]  }
  0x9e   :  { %1524 = vmatprep.subr.bf16.mxu1 %v2620_v27  ;;  %v2704_v27 = vld [vmem:[#allocation5 + $0x448] ss:$16 sps:$4 sm:$0xff]  }
  0xa0   :  { %1363 = vmatpush1.bf16.msra.mxu0 %v2615_v28  ;;  %v2709_v28 = vld [vmem:[#allocation5 + $0x484] ss:$16 sps:$4 sm:$0xff]  }
  0xa1   :  { %1525 = vmatpush1.bf16.msra.mxu1 %v2618_v29  ;;  %1364 = vmatprep.subr.bf16.mxu0 %v2623_v30  ;;  %v2712_v29 = vld [vmem:[#allocation5 + $0x46c] ss:$16 sps:$4 sm:$0xff]   ;;  %v2707_v30 = vld [vmem:[#allocation5 + $0x480] ss:$16 sps:$4 sm:$0xff]  }
  0xa2   :  { %1526 = vmatprep.subr.bf16.mxu1 %v2626_v31  ;;  %v2710_v31 = vld [vmem:[#allocation5 + $0x468] ss:$16 sps:$4 sm:$0xff]  }
  0xa4   :  { %1365 = vmatpush1.bf16.msra.mxu0 %v2621_v33  ;;  %v2718_v33 = vld [vmem:[#allocation5 + $0x48c] ss:$16 sps:$4 sm:$0xff]  }
  0xa5   :  { %1527 = vmatpush1.bf16.msra.mxu1 %v2624_v34  ;;  %1366 = vmatprep.subr.bf16.mxu0 %v2629_v36  ;;  %v2713_v34 = vld [vmem:[#allocation5 + $0x4a0] ss:$16 sps:$4 sm:$0xff]   ;;  %v2721_v36 = vld [vmem:[#allocation5 + $0x4c4] ss:$16 sps:$4 sm:$0xff]  }
  0xa6   :  { %1528 = vmatprep.subr.bf16.mxu1 %v2632_v37  ;;  %v2724_v37 = vld [vmem:[#allocation5 + $0x4ac] ss:$16 sps:$4 sm:$0xff]  }
  0xa8   :  { %1367 = vmatpush1.bf16.msra.mxu0 %v2627_v38  ;;  %v2719_v38 = vld [vmem:[#allocation5 + $0x4c0] ss:$16 sps:$4 sm:$0xff]  }
  0xa9   :  { %1529 = vmatpush1.bf16.msra.mxu1 %v2630_v39  ;;  %1368 = vmatprep.subr.bf16.mxu0 %v2635_v40  ;;  %v2722_v39 = vld [vmem:[#allocation5 + $0x4a8] ss:$16 sps:$4 sm:$0xff]   ;;  %v2727_v40 = vld [vmem:[#allocation5 + $0x4e4] ss:$16 sps:$4 sm:$0xff]  }
  0xaa   :  { %1530 = vmatprep.subr.bf16.mxu1 %v2638_v41  ;;  %v2730_v41 = vld [vmem:[#allocation5 + $0x4cc] ss:$16 sps:$4 sm:$0xff]  }
  0xac   :  { %1369 = vmatpush1.bf16.msra.mxu0 %v2633_v42  ;;  %v2725_v42 = vld [vmem:[#allocation5 + $0x4e0] ss:$16 sps:$4 sm:$0xff]  }
  0xad   :  { %1531 = vmatpush1.bf16.msra.mxu1 %v2636_v43  ;;  %1370 = vmatprep.subr.bf16.mxu0 %v2641_v44  ;;  %v2728_v43 = vld [vmem:[#allocation5 + $0x4c8] ss:$16 sps:$4 sm:$0xff]   ;;  %v2733_v44 = vld [vmem:[#allocation5 + $0x504] ss:$16 sps:$4 sm:$0xff]  }
  0xae   :  { %1532 = vmatprep.subr.bf16.mxu1 %v2644_v45  ;;  %v2736_v45 = vld [vmem:[#allocation5 + $0x4ec] ss:$16 sps:$4 sm:$0xff]  }
  0xb0   :  { %1371 = vmatpush1.bf16.msra.mxu0 %v2639_v46  ;;  %v2731_v46 = vld [vmem:[#allocation5 + $0x500] ss:$16 sps:$4 sm:$0xff]  }
  0xb1   :  { %1533 = vmatpush1.bf16.msra.mxu1 %v2642_v47  ;;  %1372 = vmatprep.subr.bf16.mxu0 %v2647_v48  ;;  %v2734_v47 = vld [vmem:[#allocation5 + $0x4e8] ss:$16 sps:$4 sm:$0xff]   ;;  %v2739_v48 = vld [vmem:[#allocation5 + $0x524] ss:$16 sps:$4 sm:$0xff]  }
  0xb2   :  { %1534 = vmatprep.subr.bf16.mxu1 %v2650_v49  ;;  %v2742_v49 = vld [vmem:[#allocation5 + $0x50c] ss:$16 sps:$4 sm:$0xff]  }
  0xb4   :  { %1373 = vmatpush1.bf16.msra.mxu0 %v2645_v50  ;;  %v2737_v50 = vld [vmem:[#allocation5 + $0x520] ss:$16 sps:$4 sm:$0xff]  }
  0xb5   :  { %1535 = vmatpush1.bf16.msra.mxu1 %v2648_v51  ;;  %1374 = vmatprep.subr.bf16.mxu0 %v2653_v52  ;;  %v2740_v51 = vld [vmem:[#allocation5 + $0x508] ss:$16 sps:$4 sm:$0xff]   ;;  %v2745_v52 = vld [vmem:[#allocation5 + $0x544] ss:$16 sps:$4 sm:$0xff]  }
  0xb6   :  { %1536 = vmatprep.subr.bf16.mxu1 %v2656_v53  ;;  %v2748_v53 = vld [vmem:[#allocation5 + $0x52c] ss:$16 sps:$4 sm:$0xff]  }
  0xb8   :  { %1375 = vmatpush1.bf16.msra.mxu0 %v2651_v54  ;;  %v2743_v54 = vld [vmem:[#allocation5 + $0x540] ss:$16 sps:$4 sm:$0xff]  }
  0xb9   :  { %1537 = vmatpush1.bf16.msra.mxu1 %v2654_v55  ;;  %1376 = vmatprep.subr.bf16.mxu0 %v2659_v56  ;;  %v2746_v55 = vld [vmem:[#allocation5 + $0x528] ss:$16 sps:$4 sm:$0xff]   ;;  %v2751_v56 = vld [vmem:[#allocation5 + $0x564] ss:$16 sps:$4 sm:$0xff]  }
  0xba   :  { %1538 = vmatprep.subr.bf16.mxu1 %v2662_v57  ;;  %v2754_v57 = vld [vmem:[#allocation5 + $0x54c] ss:$16 sps:$4 sm:$0xff]  }
  0xbc   :  { %1377 = vmatpush1.bf16.msra.mxu0 %v2657_v58  ;;  %v2749_v58 = vld [vmem:[#allocation5 + $0x560] ss:$16 sps:$4 sm:$0xff]  }
  0xbd   :  { %1539 = vmatpush1.bf16.msra.mxu1 %v2660_v59  ;;  %1378 = vmatprep.subr.bf16.mxu0 %v2665_v60  ;;  %v2752_v59 = vld [vmem:[#allocation5 + $0x548] ss:$16 sps:$4 sm:$0xff]   ;;  %v2757_v60 = vld [vmem:[#allocation5 + $0x584] ss:$16 sps:$4 sm:$0xff]  }
  0xbe   :  { %1540 = vmatprep.subr.bf16.mxu1 %v2668_v61  ;;  %v2760_v61 = vld [vmem:[#allocation5 + $0x56c] ss:$16 sps:$4 sm:$0xff]  }
  0xc0   :  { %1379 = vmatpush1.bf16.msra.mxu0 %v2663_v62  ;;  %v2755_v62 = vld [vmem:[#allocation5 + $0x580] ss:$16 sps:$4 sm:$0xff]  }
  0xc1   :  { %1541 = vmatpush1.bf16.msra.mxu1 %v2666_v63  ;;  %1380 = vmatprep.subr.bf16.mxu0 %v2671_v1  ;;  %v2758_v63 = vld [vmem:[#allocation5 + $0x568] ss:$16 sps:$4 sm:$0xff]   ;;  %v2763_v1 = vld [vmem:[#allocation5 + $0x5a4] ss:$16 sps:$4 sm:$0xff]  }
  0xc2   :  { %1542 = vmatprep.subr.bf16.mxu1 %v2674_v2  ;;  %v2766_v2 = vld [vmem:[#allocation5 + $0x58c] ss:$16 sps:$4 sm:$0xff]  }
  0xc4   :  { %1381 = vmatpush1.bf16.msra.mxu0 %v2669_v3  ;;  %v2761_v3 = vld [vmem:[#allocation5 + $0x5a0] ss:$16 sps:$4 sm:$0xff]  }
  0xc5   :  { %1543 = vmatpush1.bf16.msra.mxu1 %v2672_v4  ;;  %1382 = vmatprep.subr.bf16.mxu0 %v2677_v5  ;;  %v2764_v4 = vld [vmem:[#allocation5 + $0x588] ss:$16 sps:$4 sm:$0xff]   ;;  %v2769_v5 = vld [vmem:[#allocation5 + $0x5c4] ss:$16 sps:$4 sm:$0xff]  }
  0xc6   :  { %1544 = vmatprep.subr.bf16.mxu1 %v2680_v6  ;;  %v2772_v6 = vld [vmem:[#allocation5 + $0x5ac] ss:$16 sps:$4 sm:$0xff]  }
  0xc8   :  { %1383 = vmatpush1.bf16.msra.mxu0 %v2675_v7  ;;  %v2767_v7 = vld [vmem:[#allocation5 + $0x5c0] ss:$16 sps:$4 sm:$0xff]  }
  0xc9   :  { %1545 = vmatpush1.bf16.msra.mxu1 %v2678_v8  ;;  %1393 = vmatprep.subr.bf16.mxu0 %v2685_v9  ;;  %v2770_v8 = vld [vmem:[#allocation5 + $0x5a8] ss:$16 sps:$4 sm:$0xff]   ;;  %v2775_v9 = vld [vmem:[#allocation5 + $0x5e4] ss:$16 sps:$4 sm:$0xff]  }
  0xca   :  { %1546 = vmatprep.subr.bf16.mxu1 %v2688_v10  ;;  %v2778_v10 = vld [vmem:[#allocation5 + $0x5cc] ss:$16 sps:$4 sm:$0xff]  }
  0xcb   :  { %1385 = vmatmul.mubr.bf16.vlgmr.msra.gmra.mrb[0].mxu0 %v2129_v11 }
  0xcc   :  { %1394 = vmatpush1.bf16.msra.mxu0 %v2683_v12  ;;  %1425 = vmatprep.mubr.bf16.mxu0 %v2132_v18  ;;  %v2776_v12 = vld [vmem:[#allocation5 + $0x5c8] ss:$16 sps:$4 sm:$0xff]  }
  0xcd   :  { %1547 = vmatpush1.bf16.msra.mxu1 %v2686_v13  ;;  %1395 = vmatprep.subr.bf16.mxu0 %v2691_v14  ;;  %v2783_v13 = vld [vmem:[#allocation5 + $0x5ec] ss:$16 sps:$4 sm:$0xff]   ;;  %v2787_v14 = vld [vmem:[#allocation7 + $0x40] sm:$0xff]  }
  0xce   :  { %1557 = vmatprep.subr.bf16.mxu1 %v2694_v15  ;;  %v2131_v15 = vcombine.low %v3068_v16, %v3068_v16  ;;  %v2792_v16 = vld [vmem:[#allocation7 + $0x10] sm:$0xff]  }
  0xd0   :  { %1549 = vmatmul.mubr.bf16.vlgmr.msra.gmra.mrb[4].mxu1 %v2129_v11  ;;  %1396 = vmatpush1.bf16.msra.mxu0 %v2689_v17  ;;  %v2773_v11 = vld [vmem:[#allocation5 + $0x5e0] ss:$16 sps:$4 sm:$0xff]   ;;  %v2781_v17 = vld [vmem:[#allocation5 + $0x5e8] ss:$16 sps:$4 sm:$0xff]  }
  0xd1   :  { %1558 = vmatpush1.bf16.msra.mxu1 %v2692_v19  ;;  %1397 = vmatprep.subr.bf16.mxu0 %v2697_v20  ;;  %v2786_v19 = vld [vmem:[#allocation5 + $0x60c] ss:$16 sps:$4 sm:$0xff]  }
  0xd2   :  { %1559 = vmatprep.subr.bf16.mxu1 %v2700_v21  ;;  %1589 = vmatprep.mubr.bf16.mxu1 %v2132_v18  ;;  %v2788_v18 = vld [vmem:[#allocation7] sm:$0xff]   ;;  %v2789_v20 = vld [vmem:[#allocation7 + $0x48] sm:$0xff]  }
  0xd3   :  { %v2784_v21 = vld [vmem:[#allocation5 + $0x608] ss:$16 sps:$4 sm:$0xff]  }
  0xd4   :  { %1398 = vmatpush1.bf16.msra.mxu0 %v2695_v22  ;;  %v2790_v22 = vld [vmem:[#allocation7 + $0x8] sm:$0xff]  }
  0xd5   :  { %1560 = vmatpush1.bf16.msra.mxu1 %v2698_v23  ;;  %1399 = vmatprep.subr.bf16.mxu0 %v2703_v24  ;;  %v2791_v23 = vld [vmem:[#allocation7 + $0x50] sm:$0xff]   ;;  %v2841_v24 = vld [vmem:[#allocation2 + $0x18] ss:$0 sps:$4 sm:$0xff]  }
  0xd6   :  { %1561 = vmatprep.subr.bf16.mxu1 %v2706_v25 }
  0xd8   :  { %1400 = vmatpush1.bf16.msra.mxu0 %v2701_v26 }
  0xd9   :  { %1562 = vmatpush1.bf16.msra.mxu1 %v2704_v27  ;;  %1401 = vmatprep.subr.bf16.mxu0 %v2709_v28 }
  0xda   :  { %1563 = vmatprep.subr.bf16.mxu1 %v2712_v29  ;;  %v2793_v29 = vld [vmem:[#allocation7 + $0x58] sm:$0xff]  }
  0xdc   :  { %1402 = vmatpush1.bf16.msra.mxu0 %v2707_v30  ;;  %v2794_v30 = vld [vmem:[#allocation7 + $0x18] sm:$0xff]  }
  0xdd   :  { %1564 = vmatpush1.bf16.msra.mxu1 %v2710_v31  ;;  %1403 = vmatprep.subr.bf16.mxu0 %v2715_v32  ;;  %v2795_v31 = vld [vmem:[#allocation7 + $0xc0] sm:$0xff]  }
  0xde   :  { %1565 = vmatprep.subr.bf16.mxu1 %v2718_v33  ;;  %v2796_v32 = vld [vmem:[#allocation7 + $0x80] sm:$0xff]  }
  0xdf   :  { %v2798_v33 = vld [vmem:[#allocation7 + $0x20] sm:$0xff]  }
  0xe0   :  { %1404 = vmatpush1.bf16.msra.mxu0 %v2713_v34  ;;  %v2799_v34 = vld [vmem:[#allocation7 + $0xc8] sm:$0xff]  }
  0xe1   :  { %1566 = vmatpush1.bf16.msra.mxu1 %v2716_v35  ;;  %1405 = vmatprep.subr.bf16.mxu0 %v2721_v36  ;;  %v2800_v35 = vld [vmem:[#allocation7 + $0x88] sm:$0xff]  }
  0xe2   :  { %1567 = vmatprep.subr.bf16.mxu1 %v2724_v37  ;;  %v2801_v36 = vld [vmem:[#allocation7 + $0x68] sm:$0xff]  }
  0xe3   :  { %v2802_v37 = vld [vmem:[#allocation7 + $0x28] sm:$0xff]  }
  0xe4   :  { %1406 = vmatpush1.bf16.msra.mxu0 %v2719_v38  ;;  %v2803_v38 = vld [vmem:[#allocation7 + $0xd0] sm:$0xff]  }
  0xe5   :  { %1568 = vmatpush1.bf16.msra.mxu1 %v2722_v39  ;;  %1407 = vmatprep.subr.bf16.mxu0 %v2727_v40  ;;  %v2804_v39 = vld [vmem:[#allocation7 + $0x90] sm:$0xff]  }
  0xe6   :  { %1569 = vmatprep.subr.bf16.mxu1 %v2730_v41  ;;  %v2805_v40 = vld [vmem:[#allocation7 + $0x70] sm:$0xff]  }
  0xe7   :  { %v2806_v41 = vld [vmem:[#allocation7 + $0x30] sm:$0xff]  }
  0xe8   :  { %1408 = vmatpush1.bf16.msra.mxu0 %v2725_v42  ;;  %v2807_v42 = vld [vmem:[#allocation7 + $0xd8] sm:$0xff]  }
  0xe9   :  { %1570 = vmatpush1.bf16.msra.mxu1 %v2728_v43  ;;  %1409 = vmatprep.subr.bf16.mxu0 %v2733_v44  ;;  %v2808_v43 = vld [vmem:[#allocation7 + $0x98] sm:$0xff]  }
  0xea   :  { %1571 = vmatprep.subr.bf16.mxu1 %v2736_v45  ;;  %v2809_v44 = vld [vmem:[#allocation7 + $0x78] sm:$0xff]  }
  0xeb   :  { %v2810_v45 = vld [vmem:[#allocation7 + $0x38] sm:$0xff]  }
  0xec   :  { %1410 = vmatpush1.bf16.msra.mxu0 %v2731_v46  ;;  %v2811_v46 = vld [vmem:[#allocation7 + $0xe0] sm:$0xff]  }
  0xed   :  { %1572 = vmatpush1.bf16.msra.mxu1 %v2734_v47  ;;  %1411 = vmatprep.subr.bf16.mxu0 %v2739_v48  ;;  %v2812_v47 = vld [vmem:[#allocation7 + $0xa0] sm:$0xff]   ;;  %v2813_v48 = vld [vmem:[#allocation7 + $0xe8] sm:$0xff]  }
  0xee   :  { %1573 = vmatprep.subr.bf16.mxu1 %v2742_v49  ;;  %v2814_v49 = vld [vmem:[#allocation7 + $0xa8] sm:$0xff]  }
  0xf0   :  { %1412 = vmatpush1.bf16.msra.mxu0 %v2737_v50  ;;  %v2815_v50 = vld [vmem:[#allocation7 + $0xf0] sm:$0xff]  }
  0xf1   :  { %1574 = vmatpush1.bf16.msra.mxu1 %v2740_v51  ;;  %1413 = vmatprep.subr.bf16.mxu0 %v2745_v52  ;;  %v2816_v51 = vld [vmem:[#allocation7 + $0xb0] sm:$0xff]   ;;  %v2817_v52 = vld [vmem:[#allocation7 + $0xf8] sm:$0xff]  }
  0xf2   :  { %1575 = vmatprep.subr.bf16.mxu1 %v2748_v53  ;;  %v2818_v53 = vld [vmem:[#allocation7 + $0xb8] sm:$0xff]  }
  0xf4   :  { %1414 = vmatpush1.bf16.msra.mxu0 %v2743_v54  ;;  %v283_v54 = vlaneseq }
  0xf5   :  { %1576 = vmatpush1.bf16.msra.mxu1 %v2746_v55  ;;  %1415 = vmatprep.subr.bf16.mxu0 %v2751_v56 }
  0xf6   :  { %1577 = vmatprep.subr.bf16.mxu1 %v2754_v57  ;;  %v284_v55 = vshrl.u32 %v283_v54, 7  ;;  %v281_v57 = vld [vmem:[%s3105_s2] sm:$0xf] }
  0xf8   :  { %1416 = vmatpush1.bf16.msra.mxu0 %v2749_v58  ;;  %v285_v56 = vsub.s32 0, %v284_v55  ;;  %v289_v58 = vsub.s32 1, %v284_v55 }
  0xf9   :  { %1578 = vmatpush1.bf16.msra.mxu1 %v2752_v59  ;;  %1417 = vmatprep.subr.bf16.mxu0 %v2757_v60 }
  0xfa   :  { %1579 = vmatprep.subr.bf16.mxu1 %v2760_v61  ;;  %v286_v59 = vrot.slane %v281_v57, %v285_v56  ;;  %v290_v60 = vrot.slane %v281_v57, %v289_v58 }
  0xfc   :  { %1418 = vmatpush1.bf16.msra.mxu0 %v2755_v62 }
  0xfd   :  { %1580 = vmatpush1.bf16.msra.mxu1 %v2758_v63  ;;  %1419 = vmatprep.subr.bf16.mxu0 %v2763_v1 }
  0xfe   :  { %1581 = vmatprep.subr.bf16.mxu1 %v2766_v2 }
 0x100   :  { %1420 = vmatpush1.bf16.msra.mxu0 %v2761_v3 }
 0x101   :  { %1582 = vmatpush1.bf16.msra.mxu1 %v2764_v4  ;;  %1421 = vmatprep.subr.bf16.mxu0 %v2769_v5 }
 0x102   :  { %1583 = vmatprep.subr.bf16.mxu1 %v2772_v6  ;;  %v293_v6 = vsub.s32 2, %v284_v55 }
 0x104   :  { %1422 = vmatpush1.bf16.msra.mxu0 %v2767_v7  ;;  %v297_v7 = vsub.s32 3, %v284_v55 }
 0x105   :  { %1584 = vmatpush1.bf16.msra.mxu1 %v2770_v8  ;;  %1423 = vmatprep.subr.bf16.mxu0 %v2775_v9  ;;  %v294_v8 = vrot.slane %v281_v57, %v293_v6 }
 0x106   :  { %1585 = vmatprep.subr.bf16.mxu1 %v2778_v10  ;;  %v298_v9 = vrot.slane %v281_v57, %v297_v7 }
 0x108   :  { %1424 = vmatpush1.bf16.msra.mxu0 %v2773_v11 }
 0x109   :  { %1586 = vmatpush1.bf16.msra.mxu1 %v2776_v12  ;;  %2375 = vmatprep.subr.bf16.mxu0 %v2787_v14 }
 0x10a   :  { %1587 = vmatprep.subr.bf16.mxu1 %v2783_v13 }
 0x10b   :  { %1426 = vmatmul.mubr.bf16.vlgmr.msra.gmra.mrb[0].mxu0 %v2131_v15 }
 0x10c   :  { %2376 = vmatpush3.bf16.msra.mxu0 %v2788_v18 }
 0x10d   :  { %1588 = vmatpush1.bf16.msra.mxu1 %v2781_v17  ;;  %2377 = vmatprep.subr.bf16.mxu0 %v2789_v20 }
 0x10e   :  { %1598 = vmatprep.subr.bf16.mxu1 %v2786_v19 }
 0x110   :  { %1590 = vmatmul.mubr.bf16.vlgmr.msra.gmra.mrb[4].mxu1 %v2131_v15  ;;  %2378 = vmatpush3.bf16.msra.mxu0 %v2790_v22 }
 0x111   :  { %1599 = vmatpush1.bf16.msra.mxu1 %v2784_v21  ;;  %1630 = vmatprep.mubr.bf16.mxu1 %v2968_v0  ;;  %v2797_v0 = vld [vmem:[#allocation7 + $0x60] sm:$0xff]  }
 0x112   :  { %2379 = vmatprep.subr.bf16.mxu0 %v2791_v23  ;;  %2397 = vmatprep.subr.bf16.mxu1 %v2795_v31  ;;  %v2825_v31 = vld [vmem:[#allocation8 + $0x30] sm:$0xff]  }
 0x114   :  { %2380 = vmatpush3.bf16.msra.mxu0 %v2792_v16 }
 0x115   :  { %2381 = vmatprep.subr.bf16.mxu0 %v2793_v29  ;;  %v2823_v29 = vld [vmem:[#allocation8 + $0x20] sm:$0xff]  }
 0x118   :  { %2382 = vmatpush3.bf16.msra.mxu0 %v2794_v30  ;;  %v2824_v30 = vld [vmem:[#allocation8 + $0x28] sm:$0xff]  }
 0x119   :  { %2383 = vmatprep.subr.bf16.mxu0 %v2797_v0 }
 0x11c   :  { %2331 = vmatmul.mubr.msk.bf16.vlgmr.msra.gmra.mrb[4].mxu1 %vm1307_vm0, %v2841_v24  ;;  %2384 = vmatpush3.bf16.msra.mxu0 %v2798_v33  ;;  %v2819_v24 = vld [vmem:[#allocation8] sm:$0xff]  }
 0x11d   :  { %2398 = vmatpush3.bf16.msra.mxu1 %v2796_v32  ;;  %2385 = vmatprep.subr.bf16.mxu0 %v2801_v36  ;;  %v2826_v32 = vld [vmem:[#allocation8 + $0x38] sm:$0xff]  }
 0x11e   :  { %2399 = vmatprep.subr.bf16.mxu1 %v2799_v34 }
 0x120   :  { %2386 = vmatpush3.bf16.msra.mxu0 %v2802_v37  ;;  %v2332_v37 = vld [vmem:[%s3107_s4] ss:$0 sm:$0xff]  ;;  %s2971_s4 = smov [#allocation10]  }
 0x121   :  { %2400 = vmatpush3.bf16.msra.mxu1 %v2800_v35  ;;  %2387 = vmatprep.subr.bf16.mxu0 %v2805_v40  ;;  %s2116_s30 = sshll.u32 %s2971_s4, 4  ;;  %s2117_s30 = int_to_ptr.vmem [resolvable:$true] %s2116_s30 }
 0x122   :  { %2401 = vmatprep.subr.bf16.mxu1 %v2803_v38  ;;  %s2930_s8 = scalar_lea.vmem %s2117_s30, 128  ;;  %p2935_p5 = scmp.lt.s32.totalorder %s2117_s30, %s2117_s30 }
 0x123   :  { %v3076_v25 = vpop.f32.mrb[0].mxu1  ;;  %p2931_p4 = scmp.ne.s32.totalorder %s2117_s30, %s2930_s8  ;;  %p2936_p6 = scmp.lt.s32.totalorder %s2930_s8, %s2930_s8 }
 0x124   :  { %v3078_v26 = vpop.f32.mrb[1].mxu1  ;;  %2388 = vmatpush3.bf16.msra.mxu0 %v2806_v41 }
 0x125   :  { %v1472_v27 = vpop.f32.mrb[2].mxu1  ;;  %2402 = vmatpush3.bf16.msra.mxu1 %v2804_v39  ;;  %2389 = vmatprep.subr.bf16.mxu0 %v2809_v44  ;;  %p2937_p7 = por %p2936_p6, %p2935_p5 }
 0x126   :  { %v1473_v28 = vpop.f32.mrb[3].mxu1  ;;  %2403 = vmatprep.subr.bf16.mxu1 %v2807_v42  ;;  %v2821_v27 = vld [vmem:[#allocation8 + $0x10] sm:$0xff]  }
 0x127   :  { %v2822_v28 = vld [vmem:[#allocation8 + $0x18] sm:$0xff]   ;;  %p2938_p8 = pnand %p2937_p7, %p2931_p4 }
 0x128   :  { %2390 = vmatpush3.bf16.msra.mxu0 %v2810_v45 }
 0x129   :  { %2404 = vmatpush3.bf16.msra.mxu1 %v2808_v43 }
 0x12a   :  { %2405 = vmatprep.subr.bf16.mxu1 %v2811_v46 }
 0x12d   :  { %2406 = vmatpush3.bf16.msra.mxu1 %v2812_v47  ;;  %v2365_v47 = vld [vmem:[%s3109_s6] ss:$0 sm:$0xff] }
 0x12e   :  { %2407 = vmatprep.subr.bf16.mxu1 %v2813_v48 }
 0x131   :  { %2408 = vmatpush3.bf16.msra.mxu1 %v2814_v49 }
 0x132   :  { %2409 = vmatprep.subr.bf16.mxu1 %v2815_v50 }
 0x135   :  { %2410 = vmatpush3.bf16.msra.mxu1 %v2816_v51 }
 0x136   :  { %2411 = vmatprep.subr.bf16.mxu1 %v2817_v52 }
 0x139   :  { %2412 = vmatpush3.bf16.msra.mxu1 %v2818_v53 }
 0x1de   :  { %v1427_v61 = vpop.f32.mrb[0].mxu0 }
 0x1df   :  { %v2448_v62 = vadd.f32 %v1427_v61, %v286_v59  ;;  %v1429_v63 = vpop.f32.mrb[1].mxu0 }
 0x1e0   :  { %v2450_v1 = vadd.f32 %v1429_v63, %v290_v60  ;;  %v1431_v2 = vpop.f32.mrb[2].mxu0 }
 0x1e1   :  { %v2449_v3 = vadd.f32 %v2448_v62, %v3076_v25  ;;  %v1432_v4 = vpop.f32.mrb[3].mxu0  ;;  %v2969_v25 = vmov 0.0  }
 0x1e2   :  { %v2451_v5 = vadd.f32 %v2450_v1, %v3078_v26  ;;  %2428 = vmatprep.subr.bf16.mxu0 %v2969_v25  ;;  %v2820_v26 = vld [vmem:[#allocation8 + $0x8] sm:$0xff]  }
 0x1e3   :  { %2827 = vtanh.f32 %v2449_v3 }
 0x1e4   :  { %2829 = vtanh.f32 %v2451_v5 }
 0x1ed   :  { %v2828_v10 = vpop.eup %2827 }
 0x1ee   :  { %v2830_v11 = vpop.eup %2829  ;;  %v1643_v17 = vpack.c.bf16 %v2828_v10, %v2828_v10 }
 0x1ef   :  { %v1632_v12 = vpop.f32.mrb[4].mxu1  ;;  %v1644_v15 = vpack.c.bf16 %v2830_v11, %v2830_v11 }
 0x1f0   :  { %v2452_v13 = vadd.f32 %v1632_v12, %v294_v8  ;;  %v1634_v14 = vpop.f32.mrb[5].mxu1 }
 0x1f1   :  { %v2453_v18 = vadd.f32 %v1634_v14, %v298_v9  ;;  %v1636_v19 = vpop.f32.mrb[6].mxu1  ;;  %1942 = vmatprep.mubr.bf16.mxu0 %v1644_v15 }
 0x1f2   :  { %2831 = vtanh.f32 %v2452_v13  ;;  %v1637_v20 = vpop.f32.mrb[7].mxu1  ;;  %1943 = vmatmul.mubr.bf16.vlgmr.msra.gmra.mrb[4].mxu0 %v1643_v17 }
 0x1f3   :  { %2833 = vtanh.f32 %v2453_v18  ;;  %2429 = vmatpush3.bf16.msra.mxu0 %v2819_v24  ;;  %2444 = vmatprep.mubr.msk.bf16.mxu0 %vm2970_vm1, %v2969_v25 }
 0x1f4   :  { %2430 = vmatprep.subr.bf16.mxu0 %v2969_v25 }
 0x1f7   :  { %2431 = vmatpush3.bf16.msra.mxu0 %v2820_v26 }
 0x1f8   :  { %2432 = vmatprep.subr.bf16.mxu0 %v2969_v25 }
 0x1fb   :  { %2433 = vmatpush3.bf16.msra.mxu0 %v2821_v27 }
 0x1fc   :  { %v2832_v21 = vpop.eup %2831  ;;  %2434 = vmatprep.subr.bf16.mxu0 %v2969_v25 }
 0x1fd   :  { %v2834_v22 = vpop.eup %2833  ;;  %v1645_v16 = vpack.c.bf16 %v2832_v21, %v2832_v21 }
 0x1fe   :  { %v1646_v23 = vpack.c.bf16 %v2834_v22, %v2834_v22 }
 0x1ff   :  { %2435 = vmatpush3.bf16.msra.mxu0 %v2822_v28 }
 0x200   :  { %1982 = vmatprep.mubr.bf16.mxu1 %v1646_v23  ;;  %2436 = vmatprep.subr.bf16.mxu0 %v2969_v25 }
 0x201   :  { %1983 = vmatmul.mubr.bf16.vlgmr.msra.gmra.mrb[8].mxu1 %v1645_v16 }
 0x203   :  { %2437 = vmatpush3.bf16.msra.mxu0 %v2823_v29 }
 0x204   :  { %2438 = vmatprep.subr.bf16.mxu0 %v2969_v25 }
 0x207   :  { %2439 = vmatpush3.bf16.msra.mxu0 %v2824_v30 }
 0x208   :  { %2440 = vmatprep.subr.bf16.mxu0 %v2969_v25 }
 0x20b   :  { %2441 = vmatpush3.bf16.msra.mxu0 %v2825_v31 }
 0x20c   :  { %2442 = vmatprep.subr.bf16.mxu0 %v2969_v25 }
 0x20f   :  { %2443 = vmatpush3.bf16.msra.mxu0 %v2826_v32 }
 0x2c5   :  { %v2391_v0 = vpop.f32.mrb[4].mxu0 }
 0x2c6   :  { %v2392_v33 = vpop.f32.mrb[5].mxu0 }
 0x2c7   :  { %v2393_v34 = vadd.f32 %v2392_v33, %v2391_v0  ;;  %v2394_v35 = vpop.f32.mrb[6].mxu0 }
 0x2c8   :  { %v2395_v36 = vpop.f32.mrb[7].mxu0 }
 0x2c9   :  { %v1945_v40 = vadd.f32 %v2393_v34, %v2332_v37 }
 0x2d4   :  { %v2413_v38 = vpop.f32.mrb[8].mxu1 }
 0x2d5   :  { %v2414_v39 = vpop.f32.mrb[9].mxu1 }
 0x2d6   :  { %v2415_v41 = vadd.f32 %v2414_v39, %v2413_v38  ;;  %v2416_v42 = vpop.f32.mrb[10].mxu1 }
 0x2d7   :  { %v2417_v43 = vpop.f32.mrb[11].mxu1 }
 0x2d8   :  { %v1985_v44 = vadd.f32 %v2415_v41, %v1945_v40 }
 0x2da   :  { %2835 = vtanh.f32 %v1985_v44 }
 0x2e4   :  { %v2836_v45 = vpop.eup %2835 }
 0x2e5   :  { %v1991_v46 = vpack.c.bf16 %v2836_v45, %v2836_v45 }
 0x2e7   :  { %2445 = vmatmul.mubr.bf16.vlgmr.msra.gmra.mrb[8].mxu0 %v1991_v46 }
 0x3ba   :  { %v2097_v48 = vpop.f32.mrb[8].mxu0 }
 0x3bb   :  { %v2098_v49 = vadd.f32 %v2365_v47, %v2097_v48  ;;  %v2446_v50 = vpop.f32.mrb[9].mxu0 }
 0x3bc   :  { %v2100_v51 = vpop.f32.mrb[10].mxu0 }
 0x3bd   :  { %v2374_v52 = vmul.f32 -1.442695, %v2098_v49  ;;  %v2447_v53 = vpop.f32.mrb[11].mxu0 }
 0x3bf   :  { %2837 = vpow2.f32 %v2374_v52 }
 0x3c9   :  { %v2838_v54 = vpop.eup %2837 }
 0x3ca   :  { %v2106_v55 = vadd.f32 1.0, %v2838_v54 }
 0x3cc   :  { %2839 = vrcp.f32 %v2106_v55 }
 0x3d6   :  { %v2840_v56 = vpop.eup %2839 }
 0x3d7   :  { %2109 = vst [vmem:[#allocation10] sm:$0xff] %v2840_v56 }
 0x3d8   :  { %2941 = shalt.err (!%p2938_p8)
}
 0x3d9   :  { %s2942_s10 = scalar_lea.hbm %s3110_s7, 128 }
 0x3da   :  { %p2943_p9 = scmp.ne.s32.totalorder %s3110_s7, %s2942_s10  ;;  %p2946_p10 = scmp.lt.u32.totalorder %s2942_s10, %s3110_s7 }
 0x3dc   :  { %p2948_p11 = pnand %p2946_p10, %p2943_p9 }
 0x3de   :  { %2951 = shalt.err (!%p2948_p11)
}
 0x3df   :  { %2119 = dma.vmem_to_hbm [thread:$0]  %s2117_s30, 128, %s3110_s7, [#allocation4]  }
 0x3e0   :  { %2958 = dma.done.wait [#allocation4], 128  }
 0x3e1   :  { %2959 = vsyncadd [#allocation4], 4294967168 }
 0x3e2   :  { %2123 = vsyncpa [#allocation3], 1 }
 0x3e3   :  { %2124 = vsyncpa [#allocation6], 1 }
 0x3e4   :  { %2125 = vsyncpa [#allocation9], 1 }
 0x3e5   :  { %2126 = vsyncpa [#allocation4], 1 }

</bundles_post_ra>
